<compile_context>
chip_gen: v6e
topology: v6e:2x2x1
jax: 0.10.0
libtpu: 0.0.40
codegen_flags: <defaults>
</compile_context>

<pallas_src>
import functools

import jax
import jax.numpy as jnp
from jax import lax
from jax.experimental import pallas as pl
from jax.experimental.pallas import tpu as pltpu


def _fused_mlp_kernel(layer_meta, x_ref, p_ref, o_ref):
    """Fused forward over all layers.

    layer_meta: tuple of (w_row_offset, w_rows, b_row_offset, apply_relu),
                all static Python ints/bools (unrolled at trace time).
    x_ref:      (B_tile, PAD)  zero-padded activations.
    p_ref:      (total_rows, PAD) packed parameter slab.
    o_ref:      (B_tile, PAD)  lane-dense output slab.
    """
    y = x_ref[...].astype(jnp.float32)
    for w_off, w_rows, b_off, apply_relu in layer_meta:
        # Static, sublane-aligned slices of the packed slab (zero runtime cost).
        w = p_ref[w_off:w_off + w_rows, :]      # (PAD, PAD), (in, out) layout
        b = p_ref[b_off:b_off + 1, :]           # (1, PAD)
        # Canonical (B,K)x(K,N) contraction -> MXU native orientation.
        y = lax.dot_general(
            y, w,
            dimension_numbers=(((1,), (0,)), ((), ())),
            preferred_element_type=jnp.float32,
        )
        y = y + b                               # f32 bias add (broadcast over batch)
        if apply_relu:
            y = jnp.maximum(y, 0.0)
    o_ref[...] = y.astype(o_ref.dtype)


def mlp_forward(x, slab, layer_meta, pad, final_out):
    """Single fused pallas_call over the whole MLP.

    x:          (B, input_num) f32
    slab:       (total_rows, pad) packed params
    layer_meta: static per-layer offsets / relu flags
    """
    batch, in0 = x.shape
    # Zero-pad activations to the lane-dense width PAD (done once by XLA).
    x_pad = x if in0 == pad else jnp.pad(x, ((0, 0), (0, pad - in0)))

    kernel = functools.partial(_fused_mlp_kernel, layer_meta)
    vmem = pltpu.MemorySpace.VMEM

    if batch >= 256 and batch % 256 == 0:
        # Large-batch path: shard batch tiles across TensorCores (v7x megacore).
        tb = 256
        y = pl.pallas_call(
            kernel,
            out_shape=jax.ShapeDtypeStruct((batch, pad), x.dtype),
            grid=(batch // tb,),
            in_specs=[
                pl.BlockSpec((tb, pad), lambda i: (i, 0)),
                pl.BlockSpec(slab.shape, lambda i: (0, 0)),  # resident param slab
            ],
            out_specs=pl.BlockSpec((tb, pad), lambda i: (i, 0)),
            compiler_params=pltpu.CompilerParams(
                dimension_semantics=("parallel",)),
        )(x_pad, slab)
    else:
        # Tiny-batch path: whole-array operands, no grid (launch-overhead bound).
        y = pl.pallas_call(
            kernel,
            out_shape=jax.ShapeDtypeStruct((batch, pad), x.dtype),
            in_specs=[
                pl.BlockSpec(memory_space=vmem),
                pl.BlockSpec(memory_space=vmem),
            ],
            out_specs=pl.BlockSpec(memory_space=vmem),
        )(x_pad, slab)

    return y[:, :final_out]


def build_mlp_params(input_num, final_output_num, key):
    """Replicates the layer-size logic of the PyTorch MLP.__init__ and packs
    all parameters into one zero-padded slab.

    Returns (slab, layer_meta, pad, final_output_num, ref_params) where
      slab:       (L*(pad+8), pad) f32, per layer: pad rows of W (in,out layout,
                  zero-padded) followed by 8 rows whose first row is the bias.
      layer_meta: tuple of (w_off, w_rows, b_off, apply_relu) static metadata.
      ref_params: list of (W (in,out), b (1,out), apply_relu) for the reference.
    Deterministic uniform init mimicking PyTorch's default Linear init range.
    """
    # Reproduce the while-loop layer sizing.
    dims = []
    in_n = input_num
    while True:
        out_n = in_n
        if out_n // 2 > final_output_num:
            out_n //= 2
            dims.append((in_n, out_n, True))    # Linear + ReLU
        else:
            dims.append((in_n, final_output_num, False))  # final Linear
            break
        in_n //= 2

    max_dim = max(max(i, o) for i, o, _ in dims)
    pad = ((max_dim + 127) // 128) * 128        # lane-dense width (>=128)
    rows_per_layer = pad + 8                    # W block + bias block (8-row aligned)
    total_rows = rows_per_layer * len(dims)

    slab = jnp.zeros((total_rows, pad), jnp.float32)
    layer_meta = []
    ref_params = []
    for idx, (i_n, o_n, apply_relu) in enumerate(dims):
        key, kw, kb = jax.random.split(key, 3)
        bound = 1.0 / (i_n ** 0.5)
        # Pre-transposed (in, out) layout -> canonical MXU contraction at runtime.
        w = jax.random.uniform(kw, (i_n, o_n), jnp.float32, -bound, bound)
        b = jax.random.uniform(kb, (1, o_n), jnp.float32, -bound, bound)

        w_off = idx * rows_per_layer
        b_off = w_off + pad
        slab = slab.at[w_off:w_off + i_n, :o_n].set(w)
        slab = slab.at[b_off, :o_n].set(b[0])

        layer_meta.append((w_off, pad, b_off, apply_relu))
        ref_params.append((w, b, apply_relu))

    return slab, tuple(layer_meta), pad, final_output_num, ref_params


def mlp_forward_ref(x, ref_params):
    y = x
    for w, b, apply_relu in ref_params:
        y = y @ w + b
        if apply_relu:
            y = jnp.maximum(y, 0.0)
    return y


if __name__ == "__main__":
    key = jax.random.PRNGKey(0)
    key, kx, kp = jax.random.split(key, 3)

    batch = 2
    input_num = 32
    final_output_num = 4

    x = jax.random.normal(kx, (batch, input_num), jnp.float32)
    slab, layer_meta, pad, f_out, ref_params = build_mlp_params(
        input_num, final_output_num, kp)
    # Layers produced: Linear(32,16)+ReLU, Linear(16,8)+ReLU, Linear(8,4)

    y = mlp_forward(x, slab, layer_meta, pad, f_out)
    y = jax.block_until_ready(y)

    y_ref = mlp_forward_ref(x, ref_params)
    assert y.shape == (batch, final_output_num)
    assert jnp.allclose(y, y_ref, atol=1e-5, rtol=1e-5)

    print("KERNEL_OK")
</pallas_src>

<mosaic_0001>
module attributes {stable_mosaic.version = 11 : i64} {
  func.func @_fused_mlp_kernel(%arg0: memref<2x128xf32, #tpu.memory_space<vmem>>, %arg1: memref<408x128xf32, #tpu.memory_space<vmem>>, %arg2: memref<2x128xf32, #tpu.memory_space<vmem>>) attributes {dimension_semantics = [], scalar_prefetch = 0 : i64, scratch_operands = 0 : i64, tpu.core_type = #tpu.core_type<tc>} {
    %c0 = arith.constant 0 : index
    %c0_0 = arith.constant 0 : index
    %0 = vector.load %arg0[%c0, %c0_0] : memref<2x128xf32, #tpu.memory_space<vmem>>, vector<2x128xf32>
    %c0_1 = arith.constant 0 : index
    %c0_2 = arith.constant 0 : index
    %1 = vector.load %arg1[%c0_1, %c0_2] : memref<408x128xf32, #tpu.memory_space<vmem>>, vector<128x128xf32>
    %c128 = arith.constant 128 : index
    %c0_3 = arith.constant 0 : index
    %2 = vector.load %arg1[%c128, %c0_3] : memref<408x128xf32, #tpu.memory_space<vmem>>, vector<1x128xf32>
    %cst = arith.constant dense<0.000000e+00> : vector<2x128xf32>
    %3 = tpu.matmul %0, %1, %cst {dimension_numbers = #tpu.dot_dimension_numbers<[1], [0], [0], [1], [0, 0, 1, 1], [], []>} : vector<2x128xf32>, vector<128x128xf32>, vector<2x128xf32> -> vector<2x128xf32>
    %4 = vector.broadcast %2 : vector<1x128xf32> to vector<2x128xf32>
    %5 = arith.addf %3, %4 : vector<2x128xf32>
    %cst_4 = arith.constant 0.000000e+00 : f32
    %6 = vector.broadcast %cst_4 : f32 to vector<2x128xf32>
    %7 = arith.maximumf %5, %6 : vector<2x128xf32>
    %c136 = arith.constant 136 : index
    %c0_5 = arith.constant 0 : index
    %8 = vector.load %arg1[%c136, %c0_5] : memref<408x128xf32, #tpu.memory_space<vmem>>, vector<128x128xf32>
    %c264 = arith.constant 264 : index
    %c0_6 = arith.constant 0 : index
    %9 = vector.load %arg1[%c264, %c0_6] : memref<408x128xf32, #tpu.memory_space<vmem>>, vector<1x128xf32>
    %cst_7 = arith.constant dense<0.000000e+00> : vector<2x128xf32>
    %10 = tpu.matmul %7, %8, %cst_7 {dimension_numbers = #tpu.dot_dimension_numbers<[1], [0], [0], [1], [0, 0, 1, 1], [], []>} : vector<2x128xf32>, vector<128x128xf32>, vector<2x128xf32> -> vector<2x128xf32>
    %11 = vector.broadcast %9 : vector<1x128xf32> to vector<2x128xf32>
    %12 = arith.addf %10, %11 : vector<2x128xf32>
    %cst_8 = arith.constant 0.000000e+00 : f32
    %13 = vector.broadcast %cst_8 : f32 to vector<2x128xf32>
    %14 = arith.maximumf %12, %13 : vector<2x128xf32>
    %c272 = arith.constant 272 : index
    %c0_9 = arith.constant 0 : index
    %15 = vector.load %arg1[%c272, %c0_9] : memref<408x128xf32, #tpu.memory_space<vmem>>, vector<128x128xf32>
    %c400 = arith.constant 400 : index
    %c0_10 = arith.constant 0 : index
    %16 = vector.load %arg1[%c400, %c0_10] : memref<408x128xf32, #tpu.memory_space<vmem>>, vector<1x128xf32>
    %cst_11 = arith.constant dense<0.000000e+00> : vector<2x128xf32>
    %17 = tpu.matmul %14, %15, %cst_11 {dimension_numbers = #tpu.dot_dimension_numbers<[1], [0], [0], [1], [0, 0, 1, 1], [], []>} : vector<2x128xf32>, vector<128x128xf32>, vector<2x128xf32> -> vector<2x128xf32>
    %18 = vector.broadcast %16 : vector<1x128xf32> to vector<2x128xf32>
    %19 = arith.addf %17, %18 : vector<2x128xf32>
    %c0_12 = arith.constant 0 : index
    %c0_13 = arith.constant 0 : index
    %20 = vector.load %arg2[%c0_12, %c0_13] : memref<2x128xf32, #tpu.memory_space<vmem>>, vector<2x128xf32>
    tpu.vector_store %arg2[%c0_12, %c0_13], %19 {strides = array<i32>} : memref<2x128xf32, #tpu.memory_space<vmem>>, vector<2x128xf32>,
    return
  }
}

</mosaic_0001>

<bundles_post_ra>
// kernel: tpu_custom_call.1
= control target key start
LH: loop header
LB: loop body
LE: loop exit
PB: predicated region body
PF: predicated region fallthrough
CT: control target
= control target key end

     0   :  { %7 = vsyncpa [#allocation3], 0  ;;  %s648_s0 = inlined_call_operand.hbm [shape: f32[2,128], index: 0, kind: input, shape index: {}]   ;;  %s649_s1 = inlined_call_operand.hbm [shape: f32[408,128], index: 1, kind: input, shape index: {}]   ;;  %s650_s2 = inlined_call_operand.hbm [shape: f32[2,128], index: 2, kind: output, shape index: {}]  }
   0x1   :  { %8 = vsyncpa [#allocation6], 0 }
   0x2   :  { %9 = vsyncpa [#allocation4], 0  ;;  %s563_s9 = smov [#allocation2]   ;;  %s564_s11 = smov [#allocation5]  }
   0x3   :  { %s16_s10 = sshll.u32 %s563_s9, 4  ;;  %s25_s12 = sshll.u32 %s564_s11, 4  ;;  %s17_s10 = int_to_ptr.vmem [resolvable:$true] %s16_s10  ;;  %s26_s12 = int_to_ptr.vmem [resolvable:$true] %s25_s12 }
   0x4   :  { %s505_s13 = scalar_lea.vmem %s17_s10, 32  ;;  %p510_p1 = scmp.lt.s32.totalorder %s17_s10, %s17_s10 }
   0x5   :  { %p506_p0 = scmp.ne.s32.totalorder %s17_s10, %s505_s13  ;;  %p511_p2 = scmp.lt.s32.totalorder %s505_s13, %s505_s13 }
   0x7   :  { %p512_p3 = por %p511_p2, %p510_p1 }
   0x9   :  { %p513_p4 = pnand %p512_p3, %p506_p0 }
   0xb   :  { %516 = shalt.err (!%p513_p4)
}
   0xc   :  { %19 = dma.hbm_to_vmem [thread:$0]  %s648_s0, 32, %s17_s10, [#allocation3]  }
   0xd   :  { %s525_s16 = scalar_lea.vmem %s26_s12, 6528  ;;  %p530_p6 = scmp.lt.s32.totalorder %s26_s12, %s26_s12 }
   0xe   :  { %p526_p5 = scmp.ne.s32.totalorder %s26_s12, %s525_s16  ;;  %p531_p7 = scmp.lt.s32.totalorder %s525_s16, %s525_s16 }
  0x10   :  { %p532_p8 = por %p531_p7, %p530_p6 }
  0x12   :  { %p533_p9 = pnand %p532_p8, %p526_p5 }
  0x14   :  { %536 = shalt.err (!%p533_p9)
}
  0x15   :  { %s565_s17 = smov 128   ;;  %s566_s18 = smov 8  }
  0x16   :  { %31 = dma.hbm_to_vmem [thread:$0]  %s649_s1, 6528, %s26_s12, [#allocation6], %s565_s17, %s565_s17, %s566_s18  }
  0x17   :  { %557 = dma.done.wait [#allocation3], 32  }
  0x18   :  { %558 = vsyncadd [#allocation3], 4294967264 }
  0x19   :  { %559 = dma.done.wait [#allocation6], 6528  }
  0x1a   :  { %560 = vsyncadd [#allocation6], 4294960768  ;;  %v567_v0 = vmov 0.0   ;;  %vm568_vm0 = vmmov 0   ;;  %v54_v1 = vld [vmem:[#allocation5 + $0x78] sm:$0xff]  ;;  %v53_v2 = vld [vmem:[#allocation5 + $0x70] sm:$0xff] }
  0x1b   :  { %385 = vmatprep.subr.mxu0 %v567_v0  ;;  %417 = vmatprep.mubr.msk.f32.mxu0 %vm568_vm0, %v567_v0  ;;  %v52_v3 = vld [vmem:[#allocation5 + $0x68] sm:$0xff]  ;;  %v51_v4 = vld [vmem:[#allocation5 + $0x60] sm:$0xff]  ;;  %v50_v6 = vld [vmem:[#allocation5 + $0x58] sm:$0xff]  ;;  %s569_s0 = smov [#allocation7]  }
  0x1c   :  { %420 = vmatprep.subr.mxu1 %v567_v0  ;;  %452 = vmatprep.mubr.msk.f32.mxu1 %vm568_vm0, %v567_v0  ;;  %v146_v5 = vld [vmem:[#allocation5 + $0x100] sm:$0xff]  ;;  %v145_v7 = vld [vmem:[#allocation5 + $0xf8] sm:$0xff]  ;;  %v144_v8 = vld [vmem:[#allocation5 + $0xf0] sm:$0xff]  ;;  %s321_s1 = sshll.u32 %s569_s0, 4  ;;  %s322_s1 = int_to_ptr.vmem [resolvable:$true] %s321_s1 }
  0x1d   :  { %386 = vmatpush3.msra.mxu0 %v54_v1  ;;  %421 = vmatpush3.msra.mxu1 %v146_v5  ;;  %v49_v9 = vld [vmem:[#allocation5 + $0x50] sm:$0xff]  ;;  %v143_v10 = vld [vmem:[#allocation5 + $0xe8] sm:$0xff]  ;;  %v142_v12 = vld [vmem:[#allocation5 + $0xe0] sm:$0xff]  ;;  %s537_s21 = scalar_lea.vmem %s322_s1, 32  ;;  %p542_p11 = scmp.lt.s32.totalorder %s322_s1, %s322_s1 }
  0x1e   :  { %387 = vmatprep.subr.mxu0 %v567_v0  ;;  %422 = vmatprep.subr.mxu1 %v567_v0  ;;  %v48_v11 = vld [vmem:[#allocation5 + $0x48] sm:$0xff]  ;;  %v47_v13 = vld [vmem:[#allocation5 + $0x40] sm:$0xff]  ;;  %v141_v14 = vld [vmem:[#allocation5 + $0xd8] sm:$0xff]  ;;  %p538_p10 = scmp.ne.s32.totalorder %s322_s1, %s537_s21  ;;  %p543_p12 = scmp.lt.s32.totalorder %s537_s21, %s537_s21 }
  0x1f   :  { %388 = vmatpush3.msra.mxu0 %v53_v2  ;;  %423 = vmatpush3.msra.mxu1 %v145_v7  ;;  %v46_v15 = vld [vmem:[#allocation5 + $0x38] sm:$0xff]  ;;  %v140_v16 = vld [vmem:[#allocation5 + $0xd0] sm:$0xff]  ;;  %v139_v18 = vld [vmem:[#allocation5 + $0xc8] sm:$0xff] }
  0x20   :  { %389 = vmatprep.subr.mxu0 %v567_v0  ;;  %424 = vmatprep.subr.mxu1 %v567_v0  ;;  %v45_v17 = vld [vmem:[#allocation5 + $0x30] sm:$0xff]  ;;  %v44_v19 = vld [vmem:[#allocation5 + $0x28] sm:$0xff]  ;;  %v138_v20 = vld [vmem:[#allocation5 + $0xc0] sm:$0xff]  ;;  %p544_p13 = por %p543_p12, %p542_p11 }
  0x21   :  { %390 = vmatpush3.msra.mxu0 %v52_v3  ;;  %425 = vmatpush3.msra.mxu1 %v144_v8  ;;  %v43_v21 = vld [vmem:[#allocation5 + $0x20] sm:$0xff]  ;;  %v137_v22 = vld [vmem:[#allocation5 + $0xb8] sm:$0xff]  ;;  %v136_v24 = vld [vmem:[#allocation5 + $0xb0] sm:$0xff] }
  0x22   :  { %391 = vmatprep.subr.mxu0 %v567_v0  ;;  %426 = vmatprep.subr.mxu1 %v567_v0  ;;  %v42_v23 = vld [vmem:[#allocation5 + $0x18] sm:$0xff]  ;;  %v41_v25 = vld [vmem:[#allocation5 + $0x10] sm:$0xff]  ;;  %v135_v26 = vld [vmem:[#allocation5 + $0xa8] sm:$0xff]  ;;  %p545_p0 = pnand %p544_p13, %p538_p10 }
  0x23   :  { %392 = vmatpush3.msra.mxu0 %v51_v4  ;;  %427 = vmatpush3.msra.mxu1 %v143_v10  ;;  %v40_v27 = vld [vmem:[#allocation5 + $0x8] sm:$0xff]  ;;  %v134_v28 = vld [vmem:[#allocation5 + $0xa0] sm:$0xff]  ;;  %v38_v30 = vld [vmem:[#allocation2] sm:$0x3] }
  0x24   :  { %393 = vmatprep.subr.mxu0 %v567_v0  ;;  %428 = vmatprep.subr.mxu1 %v567_v0  ;;  %v39_v29 = vld [vmem:[#allocation5] sm:$0xff]  ;;  %v133_v31 = vld [vmem:[#allocation5 + $0x98] sm:$0xff]  ;;  %v132_v32 = vld [vmem:[#allocation5 + $0x90] sm:$0xff] }
  0x25   :  { %394 = vmatpush3.msra.mxu0 %v50_v6  ;;  %429 = vmatpush3.msra.mxu1 %v142_v12  ;;  %v131_v33 = vld [vmem:[#allocation5 + $0x88] sm:$0xff]  ;;  %v237_v35 = vld [vmem:[#allocation5 + $0x180] sm:$0xff]  ;;  %v236_v36 = vld [vmem:[#allocation5 + $0x178] sm:$0xff] }
  0x26   :  { %395 = vmatprep.subr.mxu0 %v567_v0  ;;  %430 = vmatprep.subr.mxu1 %v567_v0  ;;  %v238_v34 = vld [vmem:[#allocation5 + $0x188] sm:$0xff]  ;;  %v235_v37 = vld [vmem:[#allocation5 + $0x170] sm:$0xff]  ;;  %v233_v39 = vld [vmem:[#allocation5 + $0x160] sm:$0xff] }
  0x27   :  { %396 = vmatpush3.msra.mxu0 %v49_v9  ;;  %431 = vmatpush3.msra.mxu1 %v141_v14  ;;  %v234_v38 = vld [vmem:[#allocation5 + $0x168] sm:$0xff]  ;;  %v232_v40 = vld [vmem:[#allocation5 + $0x158] sm:$0xff]  ;;  %v231_v41 = vld [vmem:[#allocation5 + $0x150] sm:$0xff] }
  0x28   :  { %397 = vmatprep.subr.mxu0 %v567_v0  ;;  %432 = vmatprep.subr.mxu1 %v567_v0  ;;  %v230_v42 = vld [vmem:[#allocation5 + $0x148] sm:$0xff]  ;;  %v229_v43 = vld [vmem:[#allocation5 + $0x140] sm:$0xff]  ;;  %v228_v44 = vld [vmem:[#allocation5 + $0x138] sm:$0xff] }
  0x29   :  { %398 = vmatpush3.msra.mxu0 %v48_v11  ;;  %433 = vmatpush3.msra.mxu1 %v140_v16  ;;  %v227_v45 = vld [vmem:[#allocation5 + $0x130] sm:$0xff]  ;;  %v226_v46 = vld [vmem:[#allocation5 + $0x128] sm:$0xff]  ;;  %v331_v47 = vld [vmem:[#allocation5 + $0x80] ss:$0 sm:$0xff] }
  0x2a   :  { %399 = vmatprep.subr.mxu0 %v567_v0  ;;  %434 = vmatprep.subr.mxu1 %v567_v0  ;;  %v225_v52 = vld [vmem:[#allocation5 + $0x120] sm:$0xff]  ;;  %v224_v53 = vld [vmem:[#allocation5 + $0x118] sm:$0xff]  ;;  %v223_v54 = vld [vmem:[#allocation5 + $0x110] sm:$0xff] }
  0x2b   :  { %400 = vmatpush3.msra.mxu0 %v47_v13  ;;  %435 = vmatpush3.msra.mxu1 %v139_v18  ;;  %v332_v55 = vld [vmem:[#allocation5 + $0x108] ss:$0 sm:$0xff]  ;;  %v333_v60 = vld [vmem:[#allocation5 + $0x190] ss:$0 sm:$0xff] }
  0x2c   :  { %401 = vmatprep.subr.mxu0 %v567_v0  ;;  %436 = vmatprep.subr.mxu1 %v567_v0 }
  0x2d   :  { %402 = vmatpush3.msra.mxu0 %v46_v15  ;;  %437 = vmatpush3.msra.mxu1 %v138_v20 }
  0x2e   :  { %403 = vmatprep.subr.mxu0 %v567_v0  ;;  %438 = vmatprep.subr.mxu1 %v567_v0 }
  0x2f   :  { %404 = vmatpush3.msra.mxu0 %v45_v17  ;;  %439 = vmatpush3.msra.mxu1 %v137_v22 }
  0x30   :  { %405 = vmatprep.subr.mxu0 %v567_v0  ;;  %440 = vmatprep.subr.mxu1 %v567_v0 }
  0x31   :  { %406 = vmatpush3.msra.mxu0 %v44_v19  ;;  %441 = vmatpush3.msra.mxu1 %v136_v24 }
  0x32   :  { %407 = vmatprep.subr.mxu0 %v567_v0  ;;  %442 = vmatprep.subr.mxu1 %v567_v0 }
  0x33   :  { %408 = vmatpush3.msra.mxu0 %v43_v21  ;;  %443 = vmatpush3.msra.mxu1 %v135_v26 }
  0x34   :  { %409 = vmatprep.subr.mxu0 %v567_v0  ;;  %444 = vmatprep.subr.mxu1 %v567_v0 }
  0x35   :  { %410 = vmatpush3.msra.mxu0 %v42_v23  ;;  %445 = vmatpush3.msra.mxu1 %v134_v28 }
  0x36   :  { %411 = vmatprep.subr.mxu0 %v567_v0  ;;  %446 = vmatprep.subr.mxu1 %v567_v0 }
  0x37   :  { %412 = vmatpush3.msra.mxu0 %v41_v25  ;;  %447 = vmatpush3.msra.mxu1 %v133_v31 }
  0x38   :  { %413 = vmatprep.subr.mxu0 %v567_v0  ;;  %448 = vmatprep.subr.mxu1 %v567_v0 }
  0x39   :  { %414 = vmatpush3.msra.mxu0 %v40_v27  ;;  %449 = vmatpush3.msra.mxu1 %v132_v32 }
  0x3a   :  { %415 = vmatprep.subr.mxu0 %v567_v0  ;;  %450 = vmatprep.subr.mxu1 %v567_v0 }
  0x3b   :  { %416 = vmatpush3.msra.mxu0 %v39_v29  ;;  %451 = vmatpush3.msra.mxu1 %v131_v33 }
  0x3c   :  { %418 = vmatmul.mubr.f32.vlgmr.msra.gmra.mxu0 %v38_v30  ;;  %455 = vmatprep.subr.mxu0 %v567_v0 }
  0x3d   :  { %487 = vmatprep.mubr.msk.f32.mxu0 %vm568_vm0, %v567_v0  ;;  %456 = vmatpush3.msra.mxu0 %v238_v34 }
  0x3e   :  { %457 = vmatprep.subr.mxu0 %v567_v0 }
  0x3f   :  { %458 = vmatpush3.msra.mxu0 %v237_v35 }
  0x40   :  { %459 = vmatprep.subr.mxu0 %v567_v0 }
  0x41   :  { %460 = vmatpush3.msra.mxu0 %v236_v36 }
  0x42   :  { %461 = vmatprep.subr.mxu0 %v567_v0 }
  0x43   :  { %462 = vmatpush3.msra.mxu0 %v235_v37 }
  0x44   :  { %463 = vmatprep.subr.mxu0 %v567_v0 }
  0x45   :  { %464 = vmatpush3.msra.mxu0 %v234_v38 }
  0x46   :  { %465 = vmatprep.subr.mxu0 %v567_v0 }
  0x47   :  { %466 = vmatpush3.msra.mxu0 %v233_v39 }
  0x48   :  { %467 = vmatprep.subr.mxu0 %v567_v0 }
  0x49   :  { %468 = vmatpush3.msra.mxu0 %v232_v40 }
  0x4a   :  { %469 = vmatprep.subr.mxu0 %v567_v0 }
  0x4b   :  { %470 = vmatpush3.msra.mxu0 %v231_v41 }
  0x4c   :  { %471 = vmatprep.subr.mxu0 %v567_v0 }
  0x4d   :  { %472 = vmatpush3.msra.mxu0 %v230_v42 }
  0x4e   :  { %473 = vmatprep.subr.mxu0 %v567_v0 }
  0x4f   :  { %474 = vmatpush3.msra.mxu0 %v229_v43 }
  0x50   :  { %475 = vmatprep.subr.mxu0 %v567_v0 }
  0x51   :  { %476 = vmatpush3.msra.mxu0 %v228_v44 }
  0x52   :  { %477 = vmatprep.subr.mxu0 %v567_v0 }
  0x53   :  { %478 = vmatpush3.msra.mxu0 %v227_v45 }
  0x54   :  { %479 = vmatprep.subr.mxu0 %v567_v0 }
  0x55   :  { %480 = vmatpush3.msra.mxu0 %v226_v46 }
  0x56   :  { %481 = vmatprep.subr.mxu0 %v567_v0 }
  0x57   :  { %482 = vmatpush3.msra.mxu0 %v225_v52 }
  0x58   :  { %483 = vmatprep.subr.mxu0 %v567_v0 }
  0x59   :  { %484 = vmatpush3.msra.mxu0 %v224_v53 }
  0x5a   :  { %485 = vmatprep.subr.mxu0 %v567_v0 }
  0x5b   :  { %486 = vmatpush3.msra.mxu0 %v223_v54 }
  0xfc   :  { %v126_v48 = vpop.f32.mrf.mxu0 }
  0xfd   :  { %v127_v49 = vadd.f32 %v331_v47, %v126_v48 }
  0xfe   :  { %v419_v50 = vpop.f32.mrf.mxu0 }
  0xff   :  { %v130_v51 = vmax.f32 %v127_v49, 0.0 }
 0x101   :  { %453 = vmatmul.mubr.f32.vlgmr.msra.gmra.mxu1 %v130_v51 }
 0x1c1   :  { %v218_v56 = vpop.f32.mrf.mxu1 }
 0x1c2   :  { %v219_v57 = vadd.f32 %v332_v55, %v218_v56 }
 0x1c3   :  { %v454_v58 = vpop.f32.mrf.mxu1 }
 0x1c4   :  { %v222_v59 = vmax.f32 %v219_v57, 0.0 }
 0x1c6   :  { %488 = vmatmul.mubr.f32.vlgmr.msra.gmra.mxu0 %v222_v59 }
 0x286   :  { %v310_v61 = vpop.f32.mrf.mxu0 }
 0x287   :  { %v311_v62 = vadd.f32 %v333_v60, %v310_v61 }
 0x288   :  { %v489_v63 = vpop.f32.mrf.mxu0 }
 0x289   :  { %314 = vst [vmem:[#allocation7] sm:$0x3] %v311_v62 }
 0x28a   :  { %548 = shalt.err (!%p545_p0)
}
 0x28b   :  { %324 = dma.vmem_to_hbm [thread:$0]  %s322_s1, 32, %s650_s2, [#allocation4]  }
 0x28c   :  { %561 = dma.done.wait [#allocation4], 32  }
 0x28d   :  { %562 = vsyncadd [#allocation4], 4294967264 }
 0x28e   :  { %328 = vsyncpa [#allocation3], 1 }
 0x28f   :  { %329 = vsyncpa [#allocation6], 1 }
 0x290   :  { %330 = vsyncpa [#allocation4], 1 }

</bundles_post_ra>
